<compile_context>
chip_gen: v6e
topology: v6e:2x2x1
jax: 0.10.0
libtpu: 0.0.40
codegen_flags: <defaults>
</compile_context>

<pallas_src>
import jax
import jax.numpy as jnp
from jax.experimental import pallas as pl
from jax.experimental.pallas import tpu as pltpu

LANES = 128


def _round_up(n, m):
    return ((n + m - 1) // m) * m


def _padded_nbytes(shape, dtype):
    """HBM/VMEM bytes for a 2-D array under TPU (sublane, 128)-lane tiling."""
    itemsize = jnp.dtype(dtype).itemsize
    sublane = 8 * (4 // itemsize)              # f32 -> 8, bf16 -> 16
    rows = _round_up(shape[-2], sublane) if len(shape) >= 2 else 1
    cols = _round_up(shape[-1], LANES)
    lead = 1
    for d in shape[:-2]:
        lead *= d
    return lead * rows * cols * itemsize


def _mlp_kernel(xT_ref, w1_ref, b1_ref, w2_ref, b2_ref, w3_ref, b3_ref, o_ref):
    # xT_ref: (18, TB) bf16 -- batch on the 128-lane axis.
    x = xT_ref[...]

    # Layer 1: (32, 18) @ (18, TB) -> (32, TB); f32 accumulation, bias+ReLU in f32.
    h = jnp.dot(w1_ref[...], x, preferred_element_type=jnp.float32)
    h = jnp.maximum(h + b1_ref[...], 0.0)
    # TODO(synk): training-mode dropout (random mask + 1/(1-p) scale) not implemented;
    # forward matches module.eval() semantics.

    # Layer 2: (16, 32) @ (32, TB) -> (16, TB).
    h = jnp.dot(w2_ref[...], h.astype(jnp.bfloat16),
                preferred_element_type=jnp.float32)
    h = jnp.maximum(h + b2_ref[...], 0.0)

    # Output head Linear(16 -> 1): VPU broadcast-multiply + sublane reduction (keeps the
    # MXU out of a near-empty N=1 matmul).  w3_ref is (16, 1) f32.
    out = jnp.sum(h * w3_ref[...], axis=0, keepdims=True)          # (1, TB) f32
    o_ref[...] = (out + b3_ref[...]).astype(o_ref.dtype)


def binary_classifier_forward(x, params, *, batch_tile=8192, x_buffers=2,
                              x_feature_major=False):
    """Fused Pallas forward for BinaryClassifier.

    x: (B, 18) float32           (or (18, B) bf16 if x_feature_major=True)
    params: dict with PyTorch-shaped weights:
        w1 (32, 18), b1 (32,), w2 (16, 32), b2 (16,), w3 (1, 16), b3 (1,)
    batch_tile: cap on the per-step batch tile (multiple of 128; sweep 4096-16384).
    x_buffers: pipeline depth for the streamed x tile (2 = default double buffer).
    returns: (B, 1) float32 logits
    """
    assert batch_tile % LANES == 0, "batch_tile must be a multiple of the 128-lane width"

    if x_feature_major:
        F, B = x.shape
    else:
        B, F = x.shape

    # --- Tile selection: pad B to 128 lanes, split into n equal 128-aligned tiles.
    # Padding is bounded (~< n*128 rows) no matter how large batch_tile is.
    B128 = _round_up(B, LANES)
    n_tiles = pl.cdiv(B128, batch_tile)
    if B128 >= 2 * LANES:
        # v7x has 2 TensorCores per chip: keep >= 2 "parallel" tiles so both get work.
        n_tiles = max(n_tiles, 2)
    TB = _round_up(pl.cdiv(B128, n_tiles), LANES)
    n_tiles = pl.cdiv(B128, TB)
    B_pad = n_tiles * TB

    # --- Feature-major bf16 input stream (batch on the lane axis).
    if x_feature_major:
        xT = x if B_pad == B else jnp.pad(x, ((0, 0), (0, B_pad - B)))
        xT = xT.astype(jnp.bfloat16)                 # (F, B_pad), no transpose pass
    else:
        xp = x if B_pad == B else jnp.pad(x, ((0, B_pad - B), (0, 0)))
        # allow_input_fusion below lets XLA fuse this transpose+cast into the kernel's
        # input fetch when the whole forward is jitted, avoiding a separate HBM pass.
        xT = xp.T.astype(jnp.bfloat16)               # (F, B_pad)

    # Weights keep their PyTorch (out, in) shape and act as the matmul LHS.
    w1 = params["w1"].astype(jnp.bfloat16)           # (32, 18)
    b1 = params["b1"].reshape(-1, 1)                 # (32, 1)  f32
    w2 = params["w2"].astype(jnp.bfloat16)           # (16, 32)
    b2 = params["b2"].reshape(-1, 1)                 # (16, 1)  f32
    w3 = params["w3"].reshape(-1, 1)                 # (16, 1)  f32 (head stays f32)
    b3 = params["b3"].reshape(1, 1)                  # (1, 1)   f32

    H1, H2 = w1.shape[0], w2.shape[0]
    grid = (n_tiles,)

    def const_spec(a):
        return pl.BlockSpec(a.shape, lambda i: (0, 0))   # resident across the grid

    if x_buffers > 2:
        # Only deepen the streamed operand; resident weights/biases never re-DMA.
        x_spec = pl.BlockSpec((F, TB), lambda i: (0, i),
                              pipeline_mode=pl.Buffered(x_buffers))
    else:
        x_spec = pl.BlockSpec((F, TB), lambda i: (0, i))

    # Cost estimate from layout-padded sizes (x's 18 rows occupy 32 bf16 sublanes).
    flops = 2 * B_pad * (F * H1 + H1 * H2 + H2)
    bytes_accessed = (
        _padded_nbytes((F, B_pad), jnp.bfloat16)
        + sum(_padded_nbytes(a.shape, a.dtype) for a in (w1, b1, w2, b2, w3, b3))
        + _padded_nbytes((1, B_pad), jnp.float32))

    out_pad = pl.pallas_call(
        _mlp_kernel,
        out_shape=jax.ShapeDtypeStruct((1, B_pad), jnp.float32),
        grid=grid,
        in_specs=[
            x_spec,                                     # streamed x tile
            const_spec(w1), const_spec(b1),
            const_spec(w2), const_spec(b2),
            const_spec(w3), const_spec(b3),
        ],
        out_specs=pl.BlockSpec((1, TB), lambda i: (0, i)),  # lane-dense output
        compiler_params=pltpu.CompilerParams(
            dimension_semantics=("parallel",),          # shards batch tiles across TCs
            vmem_limit_bytes=32 * 1024 * 1024,          # valid on v5e/v6e/v7x scoped VMEM
            allow_input_fusion=[True, False, False, False, False, False, False],
        ),
        cost_estimate=pl.CostEstimate(
            flops=flops, transcendentals=0, bytes_accessed=bytes_accessed),
    )(xT, w1, b1, w2, b2, w3, b3)

    return out_pad[0, :B].reshape(B, 1)


def init_params(key, input_size=18, layers_dim=(32, 16)):
    """Deterministic synthetic parameter init (PyTorch Linear shapes)."""
    dims = [input_size, *layers_dim, 1]
    names = ["w1", "b1", "w2", "b2", "w3", "b3"]
    params = {}
    keys = jax.random.split(key, len(dims) - 1)
    for li, (fan_in, fan_out) in enumerate(zip(dims[:-1], dims[1:])):
        kw, kb = jax.random.split(keys[li])
        bound = 1.0 / jnp.sqrt(fan_in)
        params[names[2 * li]] = jax.random.uniform(
            kw, (fan_out, fan_in), jnp.float32, -bound, bound)
        params[names[2 * li + 1]] = jax.random.uniform(
            kb, (fan_out,), jnp.float32, -bound, bound)
    return params


def _reference_forward_bf16(x, params):
    """Plain-JAX reference matching the kernel's bf16-input / f32-accumulation math
    (eval-mode dropout = identity)."""
    bf = lambda a: a.astype(jnp.bfloat16).astype(jnp.float32)
    h = jnp.maximum(bf(x) @ bf(params["w1"]).T + params["b1"][None, :], 0.0)
    h = jnp.maximum(bf(h) @ bf(params["w2"]).T + params["b2"][None, :], 0.0)
    return h @ params["w3"].T + params["b3"][None, :]


def _reference_forward_f32(x, params):
    """Full-f32 reference matching the PyTorch module (eval mode)."""
    h = jnp.maximum(x @ params["w1"].T + params["b1"][None, :], 0.0)
    h = jnp.maximum(h @ params["w2"].T + params["b2"][None, :], 0.0)
    return h @ params["w3"].T + params["b3"][None, :]


if __name__ == "__main__":
    key = jax.random.PRNGKey(0)
    k_x, k_x2, k_p = jax.random.split(key, 3)

    input_size = 18
    params = init_params(k_p, input_size=input_size, layers_dim=(32, 16))

    fwd = jax.jit(binary_classifier_forward,
                  static_argnames=("batch_tile", "x_buffers", "x_feature_major"))

    # --- Small-batch check (single 128-lane tile).
    batch = 8
    x = jax.random.normal(k_x, (batch, input_size), jnp.float32)
    out = jax.block_until_ready(fwd(x, params))
    ref_bf = _reference_forward_bf16(x, params)
    ref_f32 = _reference_forward_f32(x, params)
    assert out.shape == (batch, 1)
    assert jnp.allclose(out, ref_bf, atol=1e-4, rtol=1e-4), "mismatch vs bf16-matched ref"
    assert jnp.allclose(out, ref_f32, atol=5e-2, rtol=5e-2), "mismatch vs f32 module ref"

    # --- Feature-major fast path (producer already emits (18, B) bf16; no transpose pass).
    out_fm = jax.block_until_ready(
        fwd(x.T.astype(jnp.bfloat16), params, x_feature_major=True))
    assert jnp.allclose(out_fm, out, atol=1e-5, rtol=1e-5), "feature-major path mismatch"

    # --- Multi-tile + bounded-padding check (B=333 with a 256-wide tile -> grid of 2).
    batch2 = 333
    x2 = jax.random.normal(k_x2, (batch2, input_size), jnp.float32)
    out2 = jax.block_until_ready(fwd(x2, params, batch_tile=256))
    ref2 = _reference_forward_bf16(x2, params)
    assert out2.shape == (batch2, 1)
    assert jnp.allclose(out2, ref2, atol=1e-4, rtol=1e-4), "multi-tile mismatch vs ref"

    print("KERNEL_OK")
</pallas_src>

<mosaic_0001>
module attributes {stable_mosaic.version = 11 : i64} {
  func.func @_mlp_kernel(%arg0: i32, %arg1: memref<18x128xbf16, #tpu.memory_space<vmem>>, %arg2: memref<32x18xbf16, #tpu.memory_space<vmem>>, %arg3: memref<32x1xf32, #tpu.memory_space<vmem>>, %arg4: memref<16x32xbf16, #tpu.memory_space<vmem>>, %arg5: memref<16x1xf32, #tpu.memory_space<vmem>>, %arg6: memref<16x1xf32, #tpu.memory_space<vmem>>, %arg7: memref<1x1xf32, #tpu.memory_space<vmem>>, %arg8: memref<1x128xf32, #tpu.memory_space<vmem>>) attributes {dimension_semantics = [#tpu.dimension_semantics<parallel>], iteration_bounds = array<i64: 1>, scalar_prefetch = 0 : i64, scratch_operands = 0 : i64, tpu.core_type = #tpu.core_type<tc>, window_params = [{transform_indices = @transform_0, window_bounds = array<i64: 18, 128>}, {pipeline_mode = #tpu.pipeline_mode<synchronous>, transform_indices = @transform_1, window_bounds = array<i64: 32, 18>}, {pipeline_mode = #tpu.pipeline_mode<synchronous>, transform_indices = @transform_2, window_bounds = array<i64: 32, 1>}, {pipeline_mode = #tpu.pipeline_mode<synchronous>, transform_indices = @transform_3, window_bounds = array<i64: 16, 32>}, {pipeline_mode = #tpu.pipeline_mode<synchronous>, transform_indices = @transform_4, window_bounds = array<i64: 16, 1>}, {pipeline_mode = #tpu.pipeline_mode<synchronous>, transform_indices = @transform_5, window_bounds = array<i64: 16, 1>}, {pipeline_mode = #tpu.pipeline_mode<synchronous>, transform_indices = @transform_6, window_bounds = array<i64: 1, 1>}, {transform_indices = @transform_7, window_bounds = array<i64: 1, 128>}]} {
    %c0 = arith.constant 0 : index
    %c0_0 = arith.constant 0 : index
    %0 = vector.load %arg1[%c0, %c0_0] : memref<18x128xbf16, #tpu.memory_space<vmem>>, vector<18x128xbf16>
    %c0_1 = arith.constant 0 : index
    %c0_2 = arith.constant 0 : index
    %1 = vector.load %arg2[%c0_1, %c0_2] : memref<32x18xbf16, #tpu.memory_space<vmem>>, vector<32x18xbf16>
    %cst = arith.constant dense<0.000000e+00> : vector<32x128xf32>
    %2 = tpu.matmul %1, %0, %cst {dimension_numbers = #tpu.dot_dimension_numbers<[1], [0], [0], [1], [0, 0, 1, 1], [], []>} : vector<32x18xbf16>, vector<18x128xbf16>, vector<32x128xf32> -> vector<32x128xf32>
    %c0_3 = arith.constant 0 : index
    %c0_4 = arith.constant 0 : index
    %3 = vector.load %arg3[%c0_3, %c0_4] : memref<32x1xf32, #tpu.memory_space<vmem>>, vector<32x1xf32>
    %4 = vector.broadcast %3 : vector<32x1xf32> to vector<32x128xf32>
    %5 = arith.addf %2, %4 : vector<32x128xf32>
    %cst_5 = arith.constant 0.000000e+00 : f32
    %6 = vector.broadcast %cst_5 : f32 to vector<32x128xf32>
    %7 = arith.maximumf %5, %6 : vector<32x128xf32>
    %c0_6 = arith.constant 0 : index
    %c0_7 = arith.constant 0 : index
    %8 = vector.load %arg4[%c0_6, %c0_7] : memref<16x32xbf16, #tpu.memory_space<vmem>>, vector<16x32xbf16>
    %9 = arith.truncf %7 : vector<32x128xf32> to vector<32x128xbf16>
    %cst_8 = arith.constant dense<0.000000e+00> : vector<16x128xf32>
    %10 = tpu.matmul %8, %9, %cst_8 {dimension_numbers = #tpu.dot_dimension_numbers<[1], [0], [0], [1], [0, 0, 1, 1], [], []>} : vector<16x32xbf16>, vector<32x128xbf16>, vector<16x128xf32> -> vector<16x128xf32>
    %c0_9 = arith.constant 0 : index
    %c0_10 = arith.constant 0 : index
    %11 = vector.load %arg5[%c0_9, %c0_10] : memref<16x1xf32, #tpu.memory_space<vmem>>, vector<16x1xf32>
    %12 = vector.broadcast %11 : vector<16x1xf32> to vector<16x128xf32>
    %13 = arith.addf %10, %12 : vector<16x128xf32>
    %cst_11 = arith.constant 0.000000e+00 : f32
    %14 = vector.broadcast %cst_11 : f32 to vector<16x128xf32>
    %15 = arith.maximumf %13, %14 : vector<16x128xf32>
    %c0_12 = arith.constant 0 : index
    %c0_13 = arith.constant 0 : index
    %16 = vector.load %arg6[%c0_12, %c0_13] : memref<16x1xf32, #tpu.memory_space<vmem>>, vector<16x1xf32>
    %17 = vector.broadcast %16 : vector<16x1xf32> to vector<16x128xf32>
    %18 = arith.mulf %15, %17 : vector<16x128xf32>
    %cst_14 = arith.constant dense<0.000000e+00> : vector<128xf32>
    %19 = vector.multi_reduction <add>, %18, %cst_14 [0] : vector<16x128xf32> to vector<128xf32>
    %20 = vector.shape_cast %19 : vector<128xf32> to vector<1x128xf32>
    %c0_15 = arith.constant 0 : index
    %c0_16 = arith.constant 0 : index
    %21 = vector.load %arg7[%c0_15, %c0_16] : memref<1x1xf32, #tpu.memory_space<vmem>>, vector<1x1xf32>
    %22 = vector.broadcast %21 : vector<1x1xf32> to vector<1x128xf32>
    %23 = arith.addf %20, %22 : vector<1x128xf32>
    %c0_17 = arith.constant 0 : index
    %c0_18 = arith.constant 0 : index
    %24 = vector.load %arg8[%c0_17, %c0_18] : memref<1x128xf32, #tpu.memory_space<vmem>>, vector<1x128xf32>
    tpu.vector_store %arg8[%c0_17, %c0_18], %23 {strides = array<i32>} : memref<1x128xf32, #tpu.memory_space<vmem>>, vector<1x128xf32>,
    return
  }
  func.func @transform_0(%arg0: i32) -> (i32, i32) {
    %c0_i32 = arith.constant 0 : i32
    %c0_i32_0 = arith.constant 0 : i32
    return %c0_i32, %arg0 : i32, i32
  }
  func.func @transform_1(%arg0: i32) -> (i32, i32) {
    %c0_i32 = arith.constant 0 : i32
    %c0_i32_0 = arith.constant 0 : i32
    %c0_i32_1 = arith.constant 0 : i32
    return %c0_i32, %c0_i32_0 : i32, i32
  }
  func.func @transform_2(%arg0: i32) -> (i32, i32) {
    %c0_i32 = arith.constant 0 : i32
    %c0_i32_0 = arith.constant 0 : i32
    %c0_i32_1 = arith.constant 0 : i32
    return %c0_i32, %c0_i32_0 : i32, i32
  }
  func.func @transform_3(%arg0: i32) -> (i32, i32) {
    %c0_i32 = arith.constant 0 : i32
    %c0_i32_0 = arith.constant 0 : i32
    %c0_i32_1 = arith.constant 0 : i32
    return %c0_i32, %c0_i32_0 : i32, i32
  }
  func.func @transform_4(%arg0: i32) -> (i32, i32) {
    %c0_i32 = arith.constant 0 : i32
    %c0_i32_0 = arith.constant 0 : i32
    %c0_i32_1 = arith.constant 0 : i32
    return %c0_i32, %c0_i32_0 : i32, i32
  }
  func.func @transform_5(%arg0: i32) -> (i32, i32) {
    %c0_i32 = arith.constant 0 : i32
    %c0_i32_0 = arith.constant 0 : i32
    %c0_i32_1 = arith.constant 0 : i32
    return %c0_i32, %c0_i32_0 : i32, i32
  }
  func.func @transform_6(%arg0: i32) -> (i32, i32) {
    %c0_i32 = arith.constant 0 : i32
    %c0_i32_0 = arith.constant 0 : i32
    %c0_i32_1 = arith.constant 0 : i32
    return %c0_i32, %c0_i32_0 : i32, i32
  }
  func.func @transform_7(%arg0: i32) -> (i32, i32) {
    %c0_i32 = arith.constant 0 : i32
    %c0_i32_0 = arith.constant 0 : i32
    return %c0_i32, %arg0 : i32, i32
  }
}

</mosaic_0001>

<bundles_post_ra>
// kernel: binary_classifier_forward.2
= control target key start
LH: loop header
LB: loop body
LE: loop exit
PB: predicated region body
PF: predicated region fallthrough
CT: control target
= control target key end

     0   :  { %s491_s0 = inlined_call_operand.vmem [shape: bf16[32,18], index: 0, kind: input, shape index: {}]   ;;  %s492_s1 = inlined_call_operand.vmem [shape: f32[32,1], index: 1, kind: input, shape index: {}]   ;;  %s493_s2 = inlined_call_operand.vmem [shape: bf16[16,32], index: 2, kind: input, shape index: {}]   ;;  %s494_s3 = inlined_call_operand.vmem [shape: f32[16,1], index: 3, kind: input, shape index: {}]   ;;  %s495_s4 = inlined_call_operand.vmem [shape: f32[16,1], index: 4, kind: input, shape index: {}]   ;;  %s496_s5 = inlined_call_operand.<no memory space> [shape: f32[1,1], index: 5, kind: input, shape index: {}]   ;;  %s497_s6 = inlined_call_operand.vmem [shape: bf16[8,18], index: 6, kind: input, shape index: {}]   ;;  %s498_s7 = inlined_call_operand.<no memory space> [shape: bf16[], index: 7, kind: input, shape index: {}]   ;;  %s499_s8 = inlined_call_operand.vmem [shape: f32[1,128], index: 8, kind: output, shape index: {}]  }
   0x1   :  { %v13_v0 = vstv %s498_s7  ;;  %v18_v1 = vstv %s496_s5 }
   0x2   :  { %v14_v2 = vunpack.i.l.bf16 %v13_v0  ;;  %19 = vst [vmem:[#allocation7] sm:$0x1] %v18_v1 }
   0x3   :  { %v51_v3 = vlaneseq  ;;  %v337_v4 = vld [vmem:[%s497_s6 + $0x8] sm:$0xf]  ;;  %v43_v5 = vld [vmem:[%s497_s6] sm:$0xff]   ;;  %vm167_vm0 = vcmask 146432   ;;  %v380_v9 = vmov 0.0   ;;  %v126_v13 = vld [vmem:[%s492_s1 + $0x10] sm:$0xff] }
   0x4   :  { %v377_v6 = vld [vmem:[%s491_s0] sm:$0xff]   ;;  %v44_v7 = vunpack.c.l.bf16 %v43_v5  ;;  %v71_v8 = vunpack.c.h.bf16 %v43_v5  ;;  %361 = vmatprep.subr.bf16.mxu1 %v380_v9  ;;  %v99_v12 = vunpack.c.l.bf16 %v337_v4  ;;  %v381_v15 = vmov 0   ;;  %v127_v19 = vld [vmem:[%s492_s1 + $0x18] sm:$0xff]  ;;  %v125_v22 = vld [vmem:[%s492_s1 + $0x8] sm:$0xff] }
   0x5   :  { %v52_v10 = vand.u32 127, %v51_v3  ;;  %v444_v11 = vshrl.u32 %v51_v3, 7  ;;  %357 = vmatprep.mubr.msk.bf16.mxu0 %vm167_vm0, %v377_v6  ;;  %373 = vset.pattern.permute.xlu0 %v381_v15  ;;  %v124_v16 = vld [vmem:[%s492_s1] sm:$0xff]  ;;  %v236_v27 = vld [vmem:[%s494_s3 + $0x8] sm:$0xff]  ;;  %vm174_vm3 = vcmask 1040384   ;;  %vm382_vm4 = vmmov 0  }
   0x6   :  { %374 = vset.pattern.permute.xlu1 %v381_v15  ;;  %140 = vperm.xlu0 %373, %v126_v13   ;;  %v235_v26 = vld [vmem:[%s494_s3] sm:$0xff]  ;;  %v300_v29 = vld [vmem:[%s495_s4 + $0x8] sm:$0xff]  ;;  %vm252_vm5 = vcmask 261120  }
   0x7   :  { %vm54_vm1 = vcmp.lt.s32.totalorder %v52_v10, 8  ;;  %v103_v14 = vadd.s32 16, %v444_v11  ;;  %130 = vperm.xlu1 %374, %v124_v16   ;;  %v299_v28 = vld [vmem:[%s495_s4] sm:$0xff]  ;;  %v378_v34 = vld [vmem:[%s491_s0 + $0x8] sm:$0xff]   ;;  %365 = vmatprep.mubr.msk.bf16.mxu1 %vm382_vm4, %v380_v9 }
   0x8   :  { %v55_v17 = vsel %vm54_vm1, %v44_v7, %v14_v2  ;;  %v82_v18 = vsel %vm54_vm1, %v71_v8, %v14_v2  ;;  %v379_v53 = vld [vmem:[%s493_s2] sm:$0xff]   ;;  %v328_v8 = vsub.s32 0, %v444_v11 }
   0x9   :  { %vm104_vm2 = vcmp.lt.s32.totalorder %v103_v14, 18  ;;  %v56_v20 = vpack.c.bf16 %v380_v9, %v55_v17  ;;  %v84_v21 = vpack.c.bf16 %v380_v9, %v82_v18  ;;  %v320_v30 = vld [vmem:[#allocation7] sm:$0x1] }
   0xa   :  { %v105_v23 = vsel %vm104_vm2, %v99_v12, %v14_v2  ;;  %145 = vperm.xlu0 %373, %v127_v19  }
   0xb   :  { %v110_v24 = vsel %vm54_vm1, %v105_v23, %v14_v2  ;;  %59 = vst [vmem:[#allocation8] sm:$0xf] %v56_v20  ;;  %87 = vst [vmem:[#allocation8 + $0x4] sm:$0xf] %v84_v21  ;;  %135 = vperm.xlu1 %374, %v125_v22  }
   0xc   :  { %v112_v25 = vpack.c.bf16 %v380_v9, %v110_v24 }
   0xe   :  { %115 = vst [vmem:[#allocation8 + $0x8] sm:$0xf] %v112_v25  ;;  %239 = vperm.xlu0 %373, %v235_v26  }
   0xf   :  { %244 = vperm.xlu1 %374, %v236_v27  }
  0x12   :  { %303 = vperm.xlu0 %373, %v299_v28   ;;  %v376_v32 = vld [vmem:[#allocation8] sm:$0xff]  }
  0x13   :  { %308 = vperm.xlu1 %374, %v300_v29  }
  0x15   :  { %v375_v31 = vld [vmem:[#allocation8 + $0x8] ss:$0 sps:$4 sm:$0x11]  }
  0x16   :  { %369 = vmatprep.subr.msk.bf16.mxu0 %vm174_vm3, %v375_v31  ;;  %v176_v33 = vsel %vm174_vm3, %v375_v31, 0  ;;  %323 = vperm.xlu0 %373, %v320_v30  }
  0x17   :  { %354 = vmatpush3.bf16.msra.mxu0 %v176_v33 }
  0x18   :  { %355 = vmatprep.subr.bf16.mxu0 %v376_v32 }
  0x1b   :  { %356 = vmatpush3.bf16.msra.mxu0 %v376_v32 }
  0x1e   :  { %358 = vmatmul.mubr.msk.bf16.vlgmr.msra.gmra.mxu0 %vm167_vm0, %v378_v34 }
  0x81   :  { %v141_v35 = vpop.permute.xlu0 %140 }
  0x82   :  { %v131_v36 = vpop.permute.xlu1 %130 }
  0x85   :  { %v146_v40 = vpop.permute.xlu0 %145 }
  0x86   :  { %v136_v43 = vpop.permute.xlu1 %135 }
  0x89   :  { %v240_v54 = vpop.permute.xlu0 %239 }
  0x8a   :  { %v245_v57 = vpop.permute.xlu1 %244 }
  0x8d   :  { %v304_v0 = vpop.permute.xlu0 %303 }
  0x8e   :  { %v309_v1 = vpop.permute.xlu1 %308 }
  0x91   :  { %v324_v10 = vpop.permute.xlu0 %323 }
  0x92   :  { %v329_v13 = vrot.slane %v324_v10, %v328_v8 }
  0xde   :  { %v359_v37 = vpop.f32.mrf.mxu0 }
  0xdf   :  { %v221_v39 = vadd.f32 %v359_v37, %v141_v35 }
  0xe0   :  { %v212_v38 = vpop.f32.mrf.mxu0 }
  0xe1   :  { %v229_v45 = vmax.f32 %v221_v39, 0.0  ;;  %v213_v46 = vadd.f32 %v212_v38, %v131_v36 }
  0xe2   :  { %v360_v41 = vpop.f32.mrf.mxu0 }
  0xe3   :  { %v224_v42 = vadd.f32 %v360_v41, %v146_v40  ;;  %v227_v51 = vmax.f32 %v213_v46, 0.0 }
  0xe4   :  { %v215_v44 = vpop.f32.mrf.mxu0 }
  0xe5   :  { %v230_v47 = vmax.f32 %v224_v42, 0.0  ;;  %v216_v48 = vadd.f32 %v215_v44, %v136_v43 }
  0xe7   :  { %v228_v49 = vmax.f32 %v216_v48, 0.0  ;;  %v234_v50 = vpack.c.bf16 %v230_v47, %v229_v45 }
  0xe9   :  { %362 = vmatpush3.bf16.msra.mxu1 %v234_v50  ;;  %v233_v52 = vpack.c.bf16 %v228_v49, %v227_v51 }
  0xea   :  { %363 = vmatprep.subr.bf16.mxu1 %v380_v9 }
  0xed   :  { %364 = vmatpush3.bf16.msra.mxu1 %v233_v52 }
  0xf0   :  { %366 = vmatmul.mubr.msk.bf16.vlgmr.msra.gmra.mxu1 %vm252_vm5, %v379_v53 }
 0x1b0   :  { %v290_v55 = vpop.f32.mrf.mxu1 }
 0x1b1   :  { %v291_v56 = vadd.f32 %v290_v55, %v240_v54 }
 0x1b2   :  { %v367_v58 = vpop.f32.mrf.mxu1 }
 0x1b3   :  { %v297_v60 = vmax.f32 %v291_v56, 0.0 }
 0x1b4   :  { %v293_v59 = vpop.f32.mrf.mxu1 }
 0x1b5   :  { %v294_v61 = vadd.f32 %v293_v59, %v245_v57  ;;  %v311_v2 = vmul.f32 %v304_v0, %v297_v60 }
 0x1b6   :  { %v368_v62 = vpop.f32.mrf.mxu1 }
 0x1b7   :  { %v298_v63 = vmax.f32 %v294_v61, 0.0 }
 0x1b9   :  { %v312_v3 = vmul.f32 %v309_v1, %v298_v63 }
 0x1bb   :  { %v313_v4 = vadd.f32 %v312_v3, %v311_v2 }
 0x1bd   :  { %v314_v5 = vrot.slane %v313_v4, 4 }
 0x1bf   :  { %v315_v6 = vadd.f32 %v314_v5, %v313_v4 }
 0x1c1   :  { %v316_v7 = vrot.slane %v315_v6, 2 }
 0x1c3   :  { %v317_v9 = vadd.f32 %v316_v7, %v315_v6 }
 0x1c5   :  { %v318_v12 = vrot.slane %v317_v9, 1 }
 0x1c7   :  { %v319_v14 = vadd.f32 %v318_v12, %v317_v9 }
 0x1c9   :  { %v330_v15 = vadd.f32 %v329_v13, %v319_v14 }
 0x1cb   :  { %331 = vst [vmem:[%s499_s8] sm:$0x1] %v330_v15 }

</bundles_post_ra>
